<compile_context>
chip_gen: v6e
topology: v6e:2x2x1
jax: 0.10.0
libtpu: 0.0.40
codegen_flags: <defaults>
</compile_context>

<pallas_src>
import jax
import jax.numpy as jnp
from jax.experimental import pallas as pl
from jax.experimental.pallas import tpu as pltpu

BN_EPS = 1e-5
FEAT = 128  # per-input feature width


def _fused_concat_linear_bn_kernel(
    x1_ref, x2_ref, x3_ref, w1_ref, w2_ref, w3_ref, gamma_ref, beta_ref, o_ref
):
    """Fused concat + Linear(384->2, bias cancelled) + BatchNorm1d(training).

    x{1,2,3}_ref: [B, 128]  the three inputs (concat fused via split weights)
    w{1,2,3}_ref: [128, 2]  pre-transposed weight slices
    gamma_ref:    [1, 2]    BN weight
    beta_ref:     [1, 2]    BN bias
    o_ref:        [B, 2]    output
    """
    x1 = x1_ref[...].astype(jnp.float32)
    x2 = x2_ref[...].astype(jnp.float32)
    x3 = x3_ref[...].astype(jnp.float32)

    # Linear over the virtual concat: x @ W == x1 @ W1 + x2 @ W2 + x3 @ W3.
    # Bias omitted: it is exactly cancelled by the BN batch-mean subtraction.
    y = (
        jnp.dot(x1, w1_ref[...], preferred_element_type=jnp.float32)
        + jnp.dot(x2, w2_ref[...], preferred_element_type=jnp.float32)
        + jnp.dot(x3, w3_ref[...], preferred_element_type=jnp.float32)
    )

    # BatchNorm1d (training mode): biased batch statistics over the batch axis,
    # folded into a single scale/shift.
    mean = jnp.mean(y, axis=0, keepdims=True)
    var = jnp.mean((y - mean) * (y - mean), axis=0, keepdims=True)
    inv_std = jax.lax.rsqrt(var + BN_EPS)
    scale = gamma_ref[...] * inv_std            # [1, 2]
    shift = beta_ref[...] - mean * scale        # [1, 2]

    o_ref[...] = (y * scale + shift).astype(o_ref.dtype)


def class_forward(in1, in2, in3, kparams):
    """Wrapper reproducing Class.forward using kernel-ready params."""
    B = in1.shape[0]

    # Advisory cost hint so XLA schedules neighbors around this tiny call.
    cost = pl.CostEstimate(
        flops=2 * B * 3 * FEAT * 2 + 8 * B * 2,
        transcendentals=2,  # the rsqrt per feature
        bytes_accessed=3 * B * FEAT * 4 + 3 * FEAT * 2 * 4 + B * 2 * 4 + 4 * 2 * 4,
    )

    vmem_bytes = max(4 * 1024 * 1024, 4 * (3 * B * FEAT + B * 2) * 4)

    return pl.pallas_call(
        _fused_concat_linear_bn_kernel,
        out_shape=jax.ShapeDtypeStruct((B, 2), jnp.float32),
        in_specs=[
            pl.BlockSpec(memory_space=pltpu.MemorySpace.VMEM),  # in1
            pl.BlockSpec(memory_space=pltpu.MemorySpace.VMEM),  # in2
            pl.BlockSpec(memory_space=pltpu.MemorySpace.VMEM),  # in3
            pl.BlockSpec(memory_space=pltpu.MemorySpace.VMEM),  # w1
            pl.BlockSpec(memory_space=pltpu.MemorySpace.VMEM),  # w2
            pl.BlockSpec(memory_space=pltpu.MemorySpace.VMEM),  # w3
            pl.BlockSpec(memory_space=pltpu.MemorySpace.VMEM),  # gamma
            pl.BlockSpec(memory_space=pltpu.MemorySpace.VMEM),  # beta
        ],
        out_specs=pl.BlockSpec(memory_space=pltpu.MemorySpace.VMEM),
        compiler_params=pltpu.CompilerParams(vmem_limit_bytes=vmem_bytes),
        cost_estimate=cost,
    )(
        in1,
        in2,
        in3,
        kparams["w1"],
        kparams["w2"],
        kparams["w3"],
        kparams["gamma"],
        kparams["beta"],
    )


def init_params(key):
    """Deterministic init matching nn.Linear(384, 2) + nn.BatchNorm1d(2) (PyTorch layout)."""
    k_w, k_b = jax.random.split(key)
    fan_in = FEAT * 3
    bound = 1.0 / jnp.sqrt(fan_in)
    w = jax.random.uniform(k_w, (2, fan_in), jnp.float32, -bound, bound)  # [out, in]
    b = jax.random.uniform(k_b, (2,), jnp.float32, -bound, bound)
    gamma = jnp.ones((2,), jnp.float32)   # BN weight init
    beta = jnp.zeros((2,), jnp.float32)   # BN bias init
    return {"w": w, "b": b, "gamma": gamma, "beta": beta}


def prepare_kernel_params(params):
    """One-time conversion to kernel-ready layout (no per-call transpose).

    The linear bias `b` is intentionally dropped: with batch-statistic BN it is
    exactly cancelled by the mean subtraction. If BN is ever switched to
    eval / running-stats mode, the bias must be re-introduced.
    """
    w = params["w"]  # [2, 384]
    return {
        "w1": jnp.asarray(w[:, 0 * FEAT : 1 * FEAT].T),  # [128, 2]
        "w2": jnp.asarray(w[:, 1 * FEAT : 2 * FEAT].T),  # [128, 2]
        "w3": jnp.asarray(w[:, 2 * FEAT : 3 * FEAT].T),  # [128, 2]
        "gamma": params["gamma"].reshape(1, 2),
        "beta": params["beta"].reshape(1, 2),
    }


def reference_forward(in1, in2, in3, params):
    """Pure-JAX reference (includes the bias, to verify its cancellation)."""
    x = jnp.concatenate([in1, in2, in3], axis=1)
    y = x @ params["w"].T + params["b"]
    mean = jnp.mean(y, axis=0, keepdims=True)
    var = jnp.mean((y - mean) ** 2, axis=0, keepdims=True)
    return params["gamma"] * (y - mean) * jax.lax.rsqrt(var + BN_EPS) + params["beta"]


if __name__ == "__main__":
    key = jax.random.PRNGKey(0)
    k_p, k1, k2, k3 = jax.random.split(key, 4)

    B = 8  # batch size (B >= 2 required for meaningful batch-stat BN)
    params = init_params(k_p)
    kparams = prepare_kernel_params(params)

    in1 = jax.random.normal(k1, (B, FEAT), jnp.float32)
    in2 = jax.random.normal(k2, (B, FEAT), jnp.float32)
    in3 = jax.random.normal(k3, (B, FEAT), jnp.float32)

    out = class_forward(in1, in2, in3, kparams)
    out = jax.block_until_ready(out)

    ref = reference_forward(in1, in2, in3, params)
    assert out.shape == (B, 2)
    assert jnp.allclose(out, ref, atol=1e-4, rtol=1e-4), "mismatch vs reference"

    print("KERNEL_OK")
</pallas_src>

<mosaic_0001>
module attributes {stable_mosaic.version = 11 : i64} {
  func.func @_fused_concat_linear_bn_kernel(%arg0: memref<8x128xf32, #tpu.memory_space<vmem>>, %arg1: memref<8x128xf32, #tpu.memory_space<vmem>>, %arg2: memref<8x128xf32, #tpu.memory_space<vmem>>, %arg3: memref<128x2xf32, #tpu.memory_space<vmem>>, %arg4: memref<128x2xf32, #tpu.memory_space<vmem>>, %arg5: memref<128x2xf32, #tpu.memory_space<vmem>>, %arg6: memref<1x2xf32, #tpu.memory_space<vmem>>, %arg7: memref<1x2xf32, #tpu.memory_space<vmem>>, %arg8: memref<8x2xf32, #tpu.memory_space<vmem>>) attributes {dimension_semantics = [], scalar_prefetch = 0 : i64, scratch_operands = 0 : i64, tpu.core_type = #tpu.core_type<tc>} {
    %c0 = arith.constant 0 : index
    %c0_0 = arith.constant 0 : index
    %0 = vector.load %arg0[%c0, %c0_0] : memref<8x128xf32, #tpu.memory_space<vmem>>, vector<8x128xf32>
    %c0_1 = arith.constant 0 : index
    %c0_2 = arith.constant 0 : index
    %1 = vector.load %arg1[%c0_1, %c0_2] : memref<8x128xf32, #tpu.memory_space<vmem>>, vector<8x128xf32>
    %c0_3 = arith.constant 0 : index
    %c0_4 = arith.constant 0 : index
    %2 = vector.load %arg2[%c0_3, %c0_4] : memref<8x128xf32, #tpu.memory_space<vmem>>, vector<8x128xf32>
    %c0_5 = arith.constant 0 : index
    %c0_6 = arith.constant 0 : index
    %3 = vector.load %arg3[%c0_5, %c0_6] : memref<128x2xf32, #tpu.memory_space<vmem>>, vector<128x2xf32>
    %cst = arith.constant dense<0.000000e+00> : vector<8x2xf32>
    %4 = tpu.matmul %0, %3, %cst {dimension_numbers = #tpu.dot_dimension_numbers<[1], [0], [0], [1], [0, 0, 1, 1], [], []>} : vector<8x128xf32>, vector<128x2xf32>, vector<8x2xf32> -> vector<8x2xf32>
    %c0_7 = arith.constant 0 : index
    %c0_8 = arith.constant 0 : index
    %5 = vector.load %arg4[%c0_7, %c0_8] : memref<128x2xf32, #tpu.memory_space<vmem>>, vector<128x2xf32>
    %cst_9 = arith.constant dense<0.000000e+00> : vector<8x2xf32>
    %6 = tpu.matmul %1, %5, %cst_9 {dimension_numbers = #tpu.dot_dimension_numbers<[1], [0], [0], [1], [0, 0, 1, 1], [], []>} : vector<8x128xf32>, vector<128x2xf32>, vector<8x2xf32> -> vector<8x2xf32>
    %7 = arith.addf %4, %6 : vector<8x2xf32>
    %c0_10 = arith.constant 0 : index
    %c0_11 = arith.constant 0 : index
    %8 = vector.load %arg5[%c0_10, %c0_11] : memref<128x2xf32, #tpu.memory_space<vmem>>, vector<128x2xf32>
    %cst_12 = arith.constant dense<0.000000e+00> : vector<8x2xf32>
    %9 = tpu.matmul %2, %8, %cst_12 {dimension_numbers = #tpu.dot_dimension_numbers<[1], [0], [0], [1], [0, 0, 1, 1], [], []>} : vector<8x128xf32>, vector<128x2xf32>, vector<8x2xf32> -> vector<8x2xf32>
    %10 = arith.addf %7, %9 : vector<8x2xf32>
    %cst_13 = arith.constant dense<0.000000e+00> : vector<2xf32>
    %11 = vector.multi_reduction <add>, %10, %cst_13 [0] : vector<8x2xf32> to vector<2xf32>
    %12 = vector.shape_cast %11 : vector<2xf32> to vector<1x2xf32>
    %cst_14 = arith.constant 8.000000e+00 : f32
    %13 = vector.broadcast %cst_14 : f32 to vector<1x2xf32>
    %14 = arith.divf %12, %13 : vector<1x2xf32>
    %15 = vector.broadcast %14 : vector<1x2xf32> to vector<8x2xf32>
    %16 = arith.subf %10, %15 : vector<8x2xf32>
    %17 = vector.broadcast %14 : vector<1x2xf32> to vector<8x2xf32>
    %18 = arith.subf %10, %17 : vector<8x2xf32>
    %19 = arith.mulf %16, %18 : vector<8x2xf32>
    %cst_15 = arith.constant dense<0.000000e+00> : vector<2xf32>
    %20 = vector.multi_reduction <add>, %19, %cst_15 [0] : vector<8x2xf32> to vector<2xf32>
    %21 = vector.shape_cast %20 : vector<2xf32> to vector<1x2xf32>
    %cst_16 = arith.constant 8.000000e+00 : f32
    %22 = vector.broadcast %cst_16 : f32 to vector<1x2xf32>
    %23 = arith.divf %21, %22 : vector<1x2xf32>
    %cst_17 = arith.constant 9.99999974E-6 : f32
    %24 = vector.broadcast %cst_17 : f32 to vector<1x2xf32>
    %25 = arith.addf %23, %24 : vector<1x2xf32>
    %26 = math.rsqrt %25 : vector<1x2xf32>
    %c0_18 = arith.constant 0 : index
    %c0_19 = arith.constant 0 : index
    %27 = vector.load %arg6[%c0_18, %c0_19] : memref<1x2xf32, #tpu.memory_space<vmem>>, vector<1x2xf32>
    %28 = arith.mulf %27, %26 : vector<1x2xf32>
    %c0_20 = arith.constant 0 : index
    %c0_21 = arith.constant 0 : index
    %29 = vector.load %arg7[%c0_20, %c0_21] : memref<1x2xf32, #tpu.memory_space<vmem>>, vector<1x2xf32>
    %30 = arith.mulf %14, %28 : vector<1x2xf32>
    %31 = arith.subf %29, %30 : vector<1x2xf32>
    %32 = vector.broadcast %28 : vector<1x2xf32> to vector<8x2xf32>
    %33 = arith.mulf %10, %32 : vector<8x2xf32>
    %34 = vector.broadcast %31 : vector<1x2xf32> to vector<8x2xf32>
    %35 = arith.addf %33, %34 : vector<8x2xf32>
    %c0_22 = arith.constant 0 : index
    %c0_23 = arith.constant 0 : index
    %36 = vector.load %arg8[%c0_22, %c0_23] : memref<8x2xf32, #tpu.memory_space<vmem>>, vector<8x2xf32>
    tpu.vector_store %arg8[%c0_22, %c0_23], %35 {strides = array<i32>} : memref<8x2xf32, #tpu.memory_space<vmem>>, vector<8x2xf32>,
    return
  }
}

</mosaic_0001>

<bundles_post_ra>
// kernel: tpu_custom_call.1
= control target key start
LH: loop header
LB: loop body
LE: loop exit
PB: predicated region body
PF: predicated region fallthrough
CT: control target
= control target key end

     0   :  { %v497_v0 = vmov 0.0   ;;  %vm498_vm0 = vmmov 0   ;;  %vm291_vm1 = vcmask 15360   ;;  %s760_s4 = inlined_call_operand.vmem [shape: f32[128,2], index: 4, kind: input, shape index: {}]   ;;  %s761_s3 = inlined_call_operand.vmem [shape: f32[128,2], index: 3, kind: input, shape index: {}]   ;;  %s762_s1 = inlined_call_operand.vmem [shape: f32[8,128], index: 1, kind: input, shape index: {}]   ;;  %s763_s0 = inlined_call_operand.vmem [shape: f32[8,128], index: 0, kind: input, shape index: {}]   ;;  %s764_s5 = inlined_call_operand.vmem [shape: f32[128,2], index: 5, kind: input, shape index: {}]   ;;  %s765_s2 = inlined_call_operand.vmem [shape: f32[8,128], index: 2, kind: input, shape index: {}]   ;;  %s766_s6 = inlined_call_operand.vmem [shape: f32[1,2], index: 6, kind: input, shape index: {}]   ;;  %s767_s7 = inlined_call_operand.vmem [shape: f32[1,2], index: 7, kind: input, shape index: {}]   ;;  %s768_s8 = inlined_call_operand.vmem [shape: f32[8,2], index: 8, kind: output, shape index: {}]  }
   0x1   :  { %388 = vmatprep.subr.mxu0 %v497_v0  ;;  %v63_v1 = vld [vmem:[%s760_s4 + $0x78] sm:$0xff]  ;;  %423 = vmatprep.subr.mxu1 %v497_v0  ;;  %v62_v3 = vld [vmem:[%s760_s4 + $0x70] sm:$0xff]  ;;  %v61_v5 = vld [vmem:[%s760_s4 + $0x68] sm:$0xff] }
   0x2   :  { %v47_v2 = vld [vmem:[%s761_s3 + $0x78] sm:$0xff]  ;;  %389 = vmatpush3.msra.mxu0 %v63_v1  ;;  %v46_v4 = vld [vmem:[%s761_s3 + $0x70] sm:$0xff]  ;;  %v45_v6 = vld [vmem:[%s761_s3 + $0x68] sm:$0xff]  ;;  %420 = vmatprep.mubr.msk.f32.mxu0 %vm498_vm0, %v497_v0 }
   0x3   :  { %424 = vmatpush3.msra.mxu1 %v47_v2  ;;  %390 = vmatprep.subr.mxu0 %v497_v0  ;;  %v60_v7 = vld [vmem:[%s760_s4 + $0x60] sm:$0xff]  ;;  %v59_v9 = vld [vmem:[%s760_s4 + $0x58] sm:$0xff]  ;;  %v58_v11 = vld [vmem:[%s760_s4 + $0x50] sm:$0xff] }
   0x4   :  { %425 = vmatprep.subr.mxu1 %v497_v0  ;;  %391 = vmatpush3.msra.mxu0 %v62_v3  ;;  %v44_v8 = vld [vmem:[%s761_s3 + $0x60] sm:$0xff]  ;;  %v43_v10 = vld [vmem:[%s761_s3 + $0x58] sm:$0xff]  ;;  %v42_v12 = vld [vmem:[%s761_s3 + $0x50] sm:$0xff] }
   0x5   :  { %426 = vmatpush3.msra.mxu1 %v46_v4  ;;  %392 = vmatprep.subr.mxu0 %v497_v0  ;;  %v57_v13 = vld [vmem:[%s760_s4 + $0x48] sm:$0xff]  ;;  %v56_v15 = vld [vmem:[%s760_s4 + $0x40] sm:$0xff]  ;;  %v55_v17 = vld [vmem:[%s760_s4 + $0x38] sm:$0xff] }
   0x6   :  { %427 = vmatprep.subr.mxu1 %v497_v0  ;;  %393 = vmatpush3.msra.mxu0 %v61_v5  ;;  %v41_v14 = vld [vmem:[%s761_s3 + $0x48] sm:$0xff]  ;;  %v40_v16 = vld [vmem:[%s761_s3 + $0x40] sm:$0xff]  ;;  %v39_v18 = vld [vmem:[%s761_s3 + $0x38] sm:$0xff] }
   0x7   :  { %428 = vmatpush3.msra.mxu1 %v45_v6  ;;  %394 = vmatprep.subr.mxu0 %v497_v0  ;;  %v54_v19 = vld [vmem:[%s760_s4 + $0x30] sm:$0xff]  ;;  %v53_v21 = vld [vmem:[%s760_s4 + $0x28] sm:$0xff]  ;;  %v52_v23 = vld [vmem:[%s760_s4 + $0x20] sm:$0xff] }
   0x8   :  { %429 = vmatprep.subr.mxu1 %v497_v0  ;;  %395 = vmatpush3.msra.mxu0 %v60_v7  ;;  %v38_v20 = vld [vmem:[%s761_s3 + $0x30] sm:$0xff]  ;;  %v37_v22 = vld [vmem:[%s761_s3 + $0x28] sm:$0xff]  ;;  %v36_v24 = vld [vmem:[%s761_s3 + $0x20] sm:$0xff] }
   0x9   :  { %430 = vmatpush3.msra.mxu1 %v44_v8  ;;  %396 = vmatprep.subr.mxu0 %v497_v0  ;;  %v51_v25 = vld [vmem:[%s760_s4 + $0x18] sm:$0xff]  ;;  %v50_v27 = vld [vmem:[%s760_s4 + $0x10] sm:$0xff]  ;;  %v49_v29 = vld [vmem:[%s760_s4 + $0x8] sm:$0xff] }
   0xa   :  { %431 = vmatprep.subr.mxu1 %v497_v0  ;;  %397 = vmatpush3.msra.mxu0 %v59_v9  ;;  %v35_v26 = vld [vmem:[%s761_s3 + $0x18] sm:$0xff]  ;;  %v34_v28 = vld [vmem:[%s761_s3 + $0x10] sm:$0xff]  ;;  %v33_v30 = vld [vmem:[%s761_s3 + $0x8] sm:$0xff] }
   0xb   :  { %432 = vmatpush3.msra.mxu1 %v43_v10  ;;  %398 = vmatprep.subr.mxu0 %v497_v0  ;;  %v48_v31 = vld [vmem:[%s760_s4] sm:$0xff]  ;;  %v219_v35 = vld [vmem:[%s764_s5 + $0x78] sm:$0xff]  ;;  %v218_v36 = vld [vmem:[%s764_s5 + $0x70] sm:$0xff] }
   0xc   :  { %433 = vmatprep.subr.mxu1 %v497_v0  ;;  %399 = vmatpush3.msra.mxu0 %v58_v11  ;;  %v30_v32 = vld [vmem:[%s762_s1] sm:$0xff]  ;;  %v217_v37 = vld [vmem:[%s764_s5 + $0x68] sm:$0xff]  ;;  %v215_v39 = vld [vmem:[%s764_s5 + $0x58] sm:$0xff] }
   0xd   :  { %434 = vmatpush3.msra.mxu1 %v42_v12  ;;  %400 = vmatprep.subr.mxu0 %v497_v0  ;;  %v32_v33 = vld [vmem:[%s761_s3] sm:$0xff]  ;;  %v214_v40 = vld [vmem:[%s764_s5 + $0x50] sm:$0xff]  ;;  %v213_v41 = vld [vmem:[%s764_s5 + $0x48] sm:$0xff] }
   0xe   :  { %435 = vmatprep.subr.mxu1 %v497_v0  ;;  %401 = vmatpush3.msra.mxu0 %v57_v13  ;;  %v29_v34 = vld [vmem:[%s763_s0] sm:$0xff]  ;;  %v211_v43 = vld [vmem:[%s764_s5 + $0x38] sm:$0xff]  ;;  %v210_v44 = vld [vmem:[%s764_s5 + $0x30] sm:$0xff] }
   0xf   :  { %436 = vmatpush3.msra.mxu1 %v41_v14  ;;  %402 = vmatprep.subr.mxu0 %v497_v0  ;;  %v216_v38 = vld [vmem:[%s764_s5 + $0x60] sm:$0xff]  ;;  %v209_v45 = vld [vmem:[%s764_s5 + $0x28] sm:$0xff]  ;;  %v207_v47 = vld [vmem:[%s764_s5 + $0x18] sm:$0xff] }
  0x10   :  { %437 = vmatprep.subr.mxu1 %v497_v0  ;;  %403 = vmatpush3.msra.mxu0 %v56_v15  ;;  %v212_v42 = vld [vmem:[%s764_s5 + $0x40] sm:$0xff]  ;;  %v206_v48 = vld [vmem:[%s764_s5 + $0x10] sm:$0xff]  ;;  %v205_v49 = vld [vmem:[%s764_s5 + $0x8] sm:$0xff]  ;;  %v319_v15 = vlaneseq }
  0x11   :  { %438 = vmatpush3.msra.mxu1 %v40_v16  ;;  %404 = vmatprep.subr.mxu0 %v497_v0  ;;  %v208_v46 = vld [vmem:[%s764_s5 + $0x20] sm:$0xff] }
  0x12   :  { %439 = vmatprep.subr.mxu1 %v497_v0  ;;  %405 = vmatpush3.msra.mxu0 %v55_v17  ;;  %v204_v50 = vld [vmem:[%s764_s5] sm:$0xff]  ;;  %v320_v16 = vshrl.u32 %v319_v15, 7 }
  0x13   :  { %440 = vmatpush3.msra.mxu1 %v39_v18  ;;  %406 = vmatprep.subr.mxu0 %v497_v0  ;;  %v31_v51 = vld [vmem:[%s765_s2] sm:$0xff] }
  0x14   :  { %441 = vmatprep.subr.mxu1 %v497_v0  ;;  %407 = vmatpush3.msra.mxu0 %v54_v19  ;;  %v313_v17 = vld [vmem:[%s766_s6] sm:$0x1]  ;;  %v321_v18 = vsub.s32 0, %v320_v16 }
  0x15   :  { %442 = vmatpush3.msra.mxu1 %v38_v20  ;;  %408 = vmatprep.subr.mxu0 %v497_v0 }
  0x16   :  { %443 = vmatprep.subr.mxu1 %v497_v0  ;;  %409 = vmatpush3.msra.mxu0 %v53_v21  ;;  %v315_v21 = vld [vmem:[%s767_s7] sm:$0x1] }
  0x17   :  { %444 = vmatpush3.msra.mxu1 %v37_v22  ;;  %410 = vmatprep.subr.mxu0 %v497_v0 }
  0x18   :  { %445 = vmatprep.subr.mxu1 %v497_v0  ;;  %411 = vmatpush3.msra.mxu0 %v52_v23 }
  0x19   :  { %446 = vmatpush3.msra.mxu1 %v36_v24  ;;  %412 = vmatprep.subr.mxu0 %v497_v0 }
  0x1a   :  { %447 = vmatprep.subr.mxu1 %v497_v0  ;;  %413 = vmatpush3.msra.mxu0 %v51_v25 }
  0x1b   :  { %448 = vmatpush3.msra.mxu1 %v35_v26  ;;  %414 = vmatprep.subr.mxu0 %v497_v0 }
  0x1c   :  { %449 = vmatprep.subr.mxu1 %v497_v0  ;;  %415 = vmatpush3.msra.mxu0 %v50_v27 }
  0x1d   :  { %450 = vmatpush3.msra.mxu1 %v34_v28  ;;  %416 = vmatprep.subr.mxu0 %v497_v0 }
  0x1e   :  { %451 = vmatprep.subr.mxu1 %v497_v0  ;;  %417 = vmatpush3.msra.mxu0 %v49_v29 }
  0x1f   :  { %452 = vmatpush3.msra.mxu1 %v33_v30  ;;  %418 = vmatprep.subr.mxu0 %v497_v0 }
  0x20   :  { %419 = vmatpush3.msra.mxu0 %v48_v31  ;;  %453 = vmatprep.subr.mxu1 %v497_v0 }
  0x21   :  { %421 = vmatmul.mubr.f32.vlgmr.msra.gmra.mxu0 %v30_v32  ;;  %454 = vmatpush3.msra.mxu1 %v32_v33 }
  0x22   :  { %455 = vmatprep.mubr.msk.f32.mxu1 %vm498_vm0, %v497_v0  ;;  %458 = vmatprep.subr.mxu0 %v497_v0 }
  0x23   :  { %456 = vmatmul.mubr.f32.vlgmr.msra.gmra.mxu1 %v29_v34  ;;  %459 = vmatpush3.msra.mxu0 %v219_v35 }
  0x24   :  { %460 = vmatprep.subr.mxu0 %v497_v0  ;;  %490 = vmatprep.mubr.msk.f32.mxu0 %vm498_vm0, %v497_v0 }
  0x25   :  { %461 = vmatpush3.msra.mxu0 %v218_v36 }
  0x26   :  { %462 = vmatprep.subr.mxu0 %v497_v0 }
  0x27   :  { %463 = vmatpush3.msra.mxu0 %v217_v37 }
  0x28   :  { %464 = vmatprep.subr.mxu0 %v497_v0 }
  0x29   :  { %465 = vmatpush3.msra.mxu0 %v216_v38 }
  0x2a   :  { %466 = vmatprep.subr.mxu0 %v497_v0 }
  0x2b   :  { %467 = vmatpush3.msra.mxu0 %v215_v39 }
  0x2c   :  { %468 = vmatprep.subr.mxu0 %v497_v0 }
  0x2d   :  { %469 = vmatpush3.msra.mxu0 %v214_v40 }
  0x2e   :  { %470 = vmatprep.subr.mxu0 %v497_v0 }
  0x2f   :  { %471 = vmatpush3.msra.mxu0 %v213_v41 }
  0x30   :  { %472 = vmatprep.subr.mxu0 %v497_v0 }
  0x31   :  { %473 = vmatpush3.msra.mxu0 %v212_v42 }
  0x32   :  { %474 = vmatprep.subr.mxu0 %v497_v0 }
  0x33   :  { %475 = vmatpush3.msra.mxu0 %v211_v43 }
  0x34   :  { %476 = vmatprep.subr.mxu0 %v497_v0 }
  0x35   :  { %477 = vmatpush3.msra.mxu0 %v210_v44 }
  0x36   :  { %478 = vmatprep.subr.mxu0 %v497_v0 }
  0x37   :  { %479 = vmatpush3.msra.mxu0 %v209_v45 }
  0x38   :  { %480 = vmatprep.subr.mxu0 %v497_v0 }
  0x39   :  { %481 = vmatpush3.msra.mxu0 %v208_v46 }
  0x3a   :  { %482 = vmatprep.subr.mxu0 %v497_v0 }
  0x3b   :  { %483 = vmatpush3.msra.mxu0 %v207_v47 }
  0x3c   :  { %484 = vmatprep.subr.mxu0 %v497_v0 }
  0x3d   :  { %485 = vmatpush3.msra.mxu0 %v206_v48 }
  0x3e   :  { %486 = vmatprep.subr.mxu0 %v497_v0 }
  0x3f   :  { %487 = vmatpush3.msra.mxu0 %v205_v49 }
  0x40   :  { %488 = vmatprep.subr.mxu0 %v497_v0 }
  0x41   :  { %489 = vmatpush3.msra.mxu0 %v204_v50 }
  0x42   :  { %491 = vmatmul.mubr.f32.vlgmr.msra.gmra.mxu0 %v31_v51 }
  0xe1   :  { %v130_v52 = vpop.f32.mrf.mxu0 }
  0xe3   :  { %v200_v53 = vpop.f32.mrf.mxu1  ;;  %v422_v54 = vpop.f32.mrf.mxu0 }
  0xe4   :  { %v201_v56 = vadd.f32 %v200_v53, %v130_v52 }
  0xe5   :  { %v457_v55 = vpop.f32.mrf.mxu1 }
 0x102   :  { %v286_v57 = vpop.f32.mrf.mxu0 }
 0x103   :  { %v290_v58 = vadd.f32 %v286_v57, %v201_v56 }
 0x104   :  { %v492_v59 = vpop.f32.mrf.mxu0 }
 0x105   :  { %v292_v60 = vsel %vm291_vm1, %v290_v58, 0.0 }
 0x106   :  { %v293_v61 = vrot.slane %v292_v60, 4 }
 0x108   :  { %v294_v62 = vadd.f32 %v293_v61, %v292_v60 }
 0x10a   :  { %v295_v63 = vrot.slane %v294_v62, 2 }
 0x10c   :  { %v296_v1 = vadd.f32 %v295_v63, %v294_v62 }
 0x10e   :  { %v297_v2 = vrot.slane %v296_v1, 1 }
 0x110   :  { %v298_v3 = vadd.f32 %v297_v2, %v296_v1 }
 0x112   :  { %v300_v0 = vmul.f32 0.125, %v298_v3 }
 0x114   :  { %v301_v4 = vsub.f32 %v290_v58, %v300_v0 }
 0x116   :  { %v302_v5 = vmul.f32 %v301_v4, %v301_v4 }
 0x118   :  { %v303_v6 = vsel %vm291_vm1, %v302_v5, 0.0 }
 0x119   :  { %v304_v7 = vrot.slane %v303_v6, 4 }
 0x11b   :  { %v305_v8 = vadd.f32 %v304_v7, %v303_v6 }
 0x11d   :  { %v306_v9 = vrot.slane %v305_v8, 2 }
 0x11f   :  { %v307_v10 = vadd.f32 %v306_v9, %v305_v8 }
 0x121   :  { %v308_v11 = vrot.slane %v307_v10, 1 }
 0x123   :  { %v309_v12 = vadd.f32 %v308_v11, %v307_v10 }
 0x125   :  { %v310_v13 = vmul.f32 0.125, %v309_v12 }
 0x127   :  { %v311_v14 = vadd.f32 1e-05, %v310_v13 }
 0x129   :  { %495 = vrsqrt.f32 %v311_v14 }
 0x136   :  { %v496_v19 = vpop.eup %495 }
 0x137   :  { %v314_v20 = vmul.f32 %v496_v19, %v313_v17 }
 0x139   :  { %v316_v22 = vmul.f32 %v314_v20, %v300_v0  ;;  %v322_v23 = vrot.slane %v314_v20, %v321_v18 }
 0x13b   :  { %v317_v24 = vsub.f32 %v315_v21, %v316_v22  ;;  %v324_v25 = vmul.f32 %v322_v23, %v290_v58 }
 0x13d   :  { %v329_v26 = vrot.slane %v317_v24, %v321_v18 }
 0x13f   :  { %v331_v27 = vadd.f32 %v329_v26, %v324_v25 }
 0x141   :  { %332 = vst.msk [vmem:[%s768_s8] sm:$0xff] %vm291_vm1, %v331_v27 }

</bundles_post_ra>
